<compile_context>
chip_gen: v5e
topology: v5e:2x2
jax: 0.10.0
libtpu: 0.0.40
codegen_flags: <defaults>
</compile_context>

<pallas_src>
import jax
import jax.numpy as jnp
from jax.experimental import pallas as pl
from jax.experimental.pallas import tpu as pltpu


# ---------------------------------------------------------------------------
# Kernel
# ---------------------------------------------------------------------------
def adapter_kernel(x_ref, w1_ref, w2_ref, o_ref):
    # x_ref:  (TB, C_in)  VMEM (double-buffered per batch tile)
    # w1_ref: (C_in, C_h) VMEM (resident across the whole grid)
    # w2_ref: (C_h, C_in) VMEM (resident across the whole grid)
    h = jnp.dot(x_ref[...], w1_ref[...], preferred_element_type=jnp.float32)
    h = jnp.maximum(h, 0.0)                                # ReLU 1 (f32)
    # Feed the second MXU pass in the weight dtype (bf16-native when weights are bf16).
    y = jnp.dot(h.astype(w2_ref.dtype), w2_ref[...],
                preferred_element_type=jnp.float32)
    y = jnp.maximum(y, 0.0)                                # ReLU 2 (f32)
    o_ref[...] = y.astype(o_ref.dtype)


# ---------------------------------------------------------------------------
# VMEM budget / tile sizing
# ---------------------------------------------------------------------------
def _vmem_budget_and_limit():
    """Chip-aware (budget_for_tiling, vmem_limit_bytes).

    Uses ~70% / ~75% of physical per-core VMEM: ~90/96 MiB on v5e/v6e (128 MiB),
    ~45/48 MiB on v7x (64 MiB). Falls back to a conservative 12 MiB budget and
    the default scoped limit if the hardware query is unavailable.
    """
    try:
        cap = getattr(pltpu.get_tpu_info(), "vmem_capacity_bytes", None)
        cap = int(cap) if cap else None
    except Exception:
        cap = None
    if cap is None or cap <= 0:
        return 12 * 1024 * 1024, None
    return int(cap * 0.70), int(cap * 0.75)


def _round_up8(n):
    return ((int(n) + 7) // 8) * 8


def _pick_batch_tile(B, C_in, C_h, x_itemsize, w_itemsize,
                     vmem_budget_bytes, weight_buffers=1):
    """Largest multiple-of-8 batch tile that fits the VMEM budget.

    Accounts for: resident weights (x weight_buffers), double-buffered x/out
    activation tiles, and the f32 intermediates (h: TB x C_h, y: TB x C_in)
    materialized inside the kernel body.
    """
    w_bytes = weight_buffers * 2 * C_in * C_h * w_itemsize
    per_row = (2 * 2 * C_in * x_itemsize          # x tile + out tile, double-buffered
               + 4 * (C_h + C_in))                # f32 intermediates h and y
    avail = max(vmem_budget_bytes - w_bytes, 8 * per_row)
    rows = max(8, (avail // per_row // 8) * 8)
    # Cap: target >= ~2 MiB per x/out block so the ~600-cycle per-step cost is
    # amortized even for narrow feature widths; no point going far beyond that.
    max_rows = _round_up8(max(1024, (2 << 20) // max(1, C_in * x_itemsize)))
    rows = min(rows, max_rows)
    # Never tile beyond the (8-rounded) batch itself.
    return int(min(rows, max(8, _round_up8(B))))


# ---------------------------------------------------------------------------
# pallas_call builder + public wrapper
# ---------------------------------------------------------------------------
def _call_adapter(x, w1, w2, block_b, vmem_limit, single_buffer_weights):
    B, C_in = x.shape
    C_h = w1.shape[1]
    num_tiles = int(pl.cdiv(B, block_b))

    # Weights use a constant block index -> loaded once, VMEM-resident. When
    # supported, single-buffer them (they are never re-fetched).
    w_kwargs = {}
    if single_buffer_weights:
        w_kwargs = {"pipeline_mode": pl.Buffered(1)}

    x_bytes = B * C_in * jnp.dtype(x.dtype).itemsize
    w_bytes = 2 * C_in * C_h * jnp.dtype(w1.dtype).itemsize
    cost = pl.CostEstimate(
        flops=4 * B * C_in * C_h,            # two (B,C_in)x(C_in,C_h)-class matmuls
        transcendentals=0,
        bytes_accessed=2 * x_bytes + w_bytes,  # read x + weights, write out
    )

    return pl.pallas_call(
        adapter_kernel,
        out_shape=jax.ShapeDtypeStruct((B, C_in), x.dtype),
        grid_spec=pl.GridSpec(
            grid=(num_tiles,),
            in_specs=[
                # Activations: one (block_b, C_in) tile per grid step (pipelined).
                # The final partial block is masked by Pallas (rows independent).
                pl.BlockSpec((block_b, C_in), lambda i: (i, 0)),
                pl.BlockSpec((C_in, C_h), lambda i: (0, 0), **w_kwargs),
                pl.BlockSpec((C_h, C_in), lambda i: (0, 0), **w_kwargs),
            ],
            out_specs=pl.BlockSpec((block_b, C_in), lambda i: (i, 0)),
        ),
        compiler_params=pltpu.CompilerParams(
            dimension_semantics=("parallel",),   # batch axis: megacore-splittable
            vmem_limit_bytes=vmem_limit,
        ),
        cost_estimate=cost,
    )(x, w1, w2)


def adapter_forward(x, w1, w2, *, block_b=None):
    """x: (B, C_in); w1: (C_in, C_h); w2: (C_h, C_in) -> (B, C_in).

    bf16 x/weights are the recommended (HBM-bandwidth-optimal) dtype; the kernel
    accumulates in f32 and casts on store, so f32 inputs also work bit-faithfully.
    """
    B, C_in = x.shape
    C_h = w1.shape[1]
    assert w1.shape == (C_in, C_h) and w2.shape == (C_h, C_in)

    budget, vmem_limit = _vmem_budget_and_limit()
    if block_b is None:
        block_b = _pick_batch_tile(
            B, C_in, C_h,
            jnp.dtype(x.dtype).itemsize, jnp.dtype(w1.dtype).itemsize,
            vmem_budget_bytes=budget, weight_buffers=1)
        # Keep at least 2 grid steps when the batch allows it, so the "parallel"
        # batch axis can actually split across v7x's two TensorCores (one extra
        # ~0.35us step elsewhere is noise for a mem-bound op).
        if B > 8:
            block_b = min(block_b, max(8, _round_up8((B + 1) // 2)))
    block_b = int(block_b)

    try:
        return _call_adapter(x, w1, w2, block_b, vmem_limit,
                             single_buffer_weights=hasattr(pl, "Buffered"))
    except Exception:
        # Fallback if this JAX build rejects single-buffered weight BlockSpecs.
        return _call_adapter(x, w1, w2, block_b, vmem_limit,
                             single_buffer_weights=False)


def _reference(x, w1, w2):
    xf = x.astype(jnp.float32)
    return jnp.maximum(
        jnp.maximum(xf @ w1.astype(jnp.float32), 0.0) @ w2.astype(jnp.float32), 0.0)


if __name__ == "__main__":
    # Small shapes consistent with the module: c_in=32, reduction=4 -> hidden=8.
    B, C_in, reduction = 8, 32, 4
    C_h = C_in // reduction

    key = jax.random.PRNGKey(0)
    kx, k1, k2, kx2, kx3 = jax.random.split(key, 5)

    x = jax.random.normal(kx, (B, C_in), dtype=jnp.float32)
    # Deterministic weight init (kaiming-uniform-ish scale, exact values irrelevant).
    w1 = jax.random.uniform(k1, (C_in, C_h), dtype=jnp.float32,
                            minval=-1.0 / (C_in ** 0.5), maxval=1.0 / (C_in ** 0.5))
    w2 = jax.random.uniform(k2, (C_h, C_in), dtype=jnp.float32,
                            minval=-1.0 / (C_h ** 0.5), maxval=1.0 / (C_h ** 0.5))

    # 1) f32 path, exact check against the reference.
    out = jax.block_until_ready(adapter_forward(x, w1, w2))
    assert out.shape == (B, C_in)
    assert jnp.allclose(out, _reference(x, w1, w2), atol=1e-5, rtol=1e-5)

    # 2) Tiled + partial-final-block path (no wrapper pad/slice): B not a multiple
    #    of the explicit tile, multiple grid steps.
    B2 = 1000
    x2 = jax.random.normal(kx2, (B2, C_in), dtype=jnp.float32)
    out2 = jax.block_until_ready(adapter_forward(x2, w1, w2, block_b=256))
    assert out2.shape == (B2, C_in)
    assert jnp.allclose(out2, _reference(x2, w1, w2), atol=1e-5, rtol=1e-5)

    # 3) Recommended bf16 I/O path (f32 accumulation in-kernel), auto tile sizing.
    B3 = 64
    x3 = jax.random.normal(kx3, (B3, C_in), dtype=jnp.float32)
    out3 = adapter_forward(x3.astype(jnp.bfloat16),
                           w1.astype(jnp.bfloat16), w2.astype(jnp.bfloat16))
    out3 = jax.block_until_ready(out3)
    assert out3.shape == (B3, C_in) and out3.dtype == jnp.bfloat16
    ref3 = _reference(x3.astype(jnp.bfloat16), w1.astype(jnp.bfloat16),
                      w2.astype(jnp.bfloat16))
    assert jnp.allclose(out3.astype(jnp.float32), ref3, atol=5e-2, rtol=5e-2)

    print("KERNEL_OK")
</pallas_src>

<mosaic_0001>
module attributes {stable_mosaic.version = 11 : i64} {
  func.func @adapter_kernel(%arg0: i32, %arg1: memref<8x32xf32, #tpu.memory_space<vmem>>, %arg2: memref<32x8xf32, #tpu.memory_space<vmem>>, %arg3: memref<8x32xf32, #tpu.memory_space<vmem>>, %arg4: memref<8x32xf32, #tpu.memory_space<vmem>>) attributes {dimension_semantics = [#tpu.dimension_semantics<parallel>], iteration_bounds = array<i64: 1>, scalar_prefetch = 0 : i64, scratch_operands = 0 : i64, tpu.core_type = #tpu.core_type<tc>, window_params = [{transform_indices = @transform_0, window_bounds = array<i64: 8, 32>}, {pipeline_mode = #tpu.pipeline_mode<synchronous>, transform_indices = @transform_1, window_bounds = array<i64: 32, 8>}, {pipeline_mode = #tpu.pipeline_mode<synchronous>, transform_indices = @transform_2, window_bounds = array<i64: 8, 32>}, {transform_indices = @transform_3, window_bounds = array<i64: 8, 32>}]} {
    %c0 = arith.constant 0 : index
    %c0_0 = arith.constant 0 : index
    %0 = vector.load %arg1[%c0, %c0_0] : memref<8x32xf32, #tpu.memory_space<vmem>>, vector<8x32xf32>
    %c0_1 = arith.constant 0 : index
    %c0_2 = arith.constant 0 : index
    %1 = vector.load %arg2[%c0_1, %c0_2] : memref<32x8xf32, #tpu.memory_space<vmem>>, vector<32x8xf32>
    %cst = arith.constant dense<0.000000e+00> : vector<8x8xf32>
    %2 = tpu.matmul %0, %1, %cst {dimension_numbers = #tpu.dot_dimension_numbers<[1], [0], [0], [1], [0, 0, 1, 1], [], []>} : vector<8x32xf32>, vector<32x8xf32>, vector<8x8xf32> -> vector<8x8xf32>
    %cst_3 = arith.constant 0.000000e+00 : f32
    %3 = vector.broadcast %cst_3 : f32 to vector<8x8xf32>
    %4 = arith.maximumf %2, %3 : vector<8x8xf32>
    %c0_4 = arith.constant 0 : index
    %c0_5 = arith.constant 0 : index
    %5 = vector.load %arg3[%c0_4, %c0_5] : memref<8x32xf32, #tpu.memory_space<vmem>>, vector<8x32xf32>
    %cst_6 = arith.constant dense<0.000000e+00> : vector<8x32xf32>
    %6 = tpu.matmul %4, %5, %cst_6 {dimension_numbers = #tpu.dot_dimension_numbers<[1], [0], [0], [1], [0, 0, 1, 1], [], []>} : vector<8x8xf32>, vector<8x32xf32>, vector<8x32xf32> -> vector<8x32xf32>
    %cst_7 = arith.constant 0.000000e+00 : f32
    %7 = vector.broadcast %cst_7 : f32 to vector<8x32xf32>
    %8 = arith.maximumf %6, %7 : vector<8x32xf32>
    %c0_8 = arith.constant 0 : index
    %c0_9 = arith.constant 0 : index
    %9 = vector.load %arg4[%c0_8, %c0_9] : memref<8x32xf32, #tpu.memory_space<vmem>>, vector<8x32xf32>
    tpu.vector_store %arg4[%c0_8, %c0_9], %8 {strides = array<i32>} : memref<8x32xf32, #tpu.memory_space<vmem>>, vector<8x32xf32>,
    return
  }
  func.func @transform_0(%arg0: i32) -> (i32, i32) {
    %c0_i32 = arith.constant 0 : i32
    %c0_i32_0 = arith.constant 0 : i32
    return %arg0, %c0_i32 : i32, i32
  }
  func.func @transform_1(%arg0: i32) -> (i32, i32) {
    %c0_i32 = arith.constant 0 : i32
    %c0_i32_0 = arith.constant 0 : i32
    %c0_i32_1 = arith.constant 0 : i32
    return %c0_i32, %c0_i32_0 : i32, i32
  }
  func.func @transform_2(%arg0: i32) -> (i32, i32) {
    %c0_i32 = arith.constant 0 : i32
    %c0_i32_0 = arith.constant 0 : i32
    %c0_i32_1 = arith.constant 0 : i32
    return %c0_i32, %c0_i32_0 : i32, i32
  }
  func.func @transform_3(%arg0: i32) -> (i32, i32) {
    %c0_i32 = arith.constant 0 : i32
    %c0_i32_0 = arith.constant 0 : i32
    return %arg0, %c0_i32 : i32, i32
  }
}

module attributes {stable_mosaic.version = 11 : i64} {
  func.func @adapter_kernel(%arg0: i32, %arg1: memref<8x32xf32, #tpu.memory_space<vmem>>, %arg2: memref<32x8xf32, #tpu.memory_space<vmem>>, %arg3: memref<8x32xf32, #tpu.memory_space<vmem>>, %arg4: memref<8x32xf32, #tpu.memory_space<vmem>>) attributes {dimension_semantics = [#tpu.dimension_semantics<parallel>], iteration_bounds = array<i64: 1>, scalar_prefetch = 0 : i64, scratch_operands = 0 : i64, tpu.core_type = #tpu.core_type<tc>, window_params = [{transform_indices = @transform_0, window_bounds = array<i64: 8, 32>}, {pipeline_mode = #tpu.pipeline_mode<synchronous>, transform_indices = @transform_1, window_bounds = array<i64: 32, 8>}, {pipeline_mode = #tpu.pipeline_mode<synchronous>, transform_indices = @transform_2, window_bounds = array<i64: 8, 32>}, {transform_indices = @transform_3, window_bounds = array<i64: 8, 32>}]} {
    %c0 = arith.constant 0 : index
    %c0_0 = arith.constant 0 : index
    %0 = vector.load %arg1[%c0, %c0_0] : memref<8x32xf32, #tpu.memory_space<vmem>>, vector<8x32xf32>
    %c0_1 = arith.constant 0 : index
    %c0_2 = arith.constant 0 : index
    %1 = vector.load %arg2[%c0_1, %c0_2] : memref<32x8xf32, #tpu.memory_space<vmem>>, vector<32x8xf32>
    %cst = arith.constant dense<0.000000e+00> : vector<8x8xf32>
    %2 = tpu.matmul %0, %1, %cst {dimension_numbers = #tpu.dot_dimension_numbers<[1], [0], [0], [1], [0, 0, 1, 1], [], []>} : vector<8x32xf32>, vector<32x8xf32>, vector<8x8xf32> -> vector<8x8xf32>
    %cst_3 = arith.constant 0.000000e+00 : f32
    %3 = vector.broadcast %cst_3 : f32 to vector<8x8xf32>
    %4 = arith.maximumf %2, %3 : vector<8x8xf32>
    %c0_4 = arith.constant 0 : index
    %c0_5 = arith.constant 0 : index
    %5 = vector.load %arg3[%c0_4, %c0_5] : memref<8x32xf32, #tpu.memory_space<vmem>>, vector<8x32xf32>
    %cst_6 = arith.constant dense<0.000000e+00> : vector<8x32xf32>
    %6 = tpu.matmul %4, %5, %cst_6 {dimension_numbers = #tpu.dot_dimension_numbers<[1], [0], [0], [1], [0, 0, 1, 1], [], []>} : vector<8x8xf32>, vector<8x32xf32>, vector<8x32xf32> -> vector<8x32xf32>
    %cst_7 = arith.constant 0.000000e+00 : f32
    %7 = vector.broadcast %cst_7 : f32 to vector<8x32xf32>
    %8 = arith.maximumf %6, %7 : vector<8x32xf32>
    %c0_8 = arith.constant 0 : index
    %c0_9 = arith.constant 0 : index
    %9 = vector.load %arg4[%c0_8, %c0_9] : memref<8x32xf32, #tpu.memory_space<vmem>>, vector<8x32xf32>
    tpu.vector_store %arg4[%c0_8, %c0_9], %8 {strides = array<i32>} : memref<8x32xf32, #tpu.memory_space<vmem>>, vector<8x32xf32>,
    return
  }
  func.func @transform_0(%arg0: i32) -> (i32, i32) {
    %c0_i32 = arith.constant 0 : i32
    %c0_i32_0 = arith.constant 0 : i32
    return %arg0, %c0_i32 : i32, i32
  }
  func.func @transform_1(%arg0: i32) -> (i32, i32) {
    %c0_i32 = arith.constant 0 : i32
    %c0_i32_0 = arith.constant 0 : i32
    %c0_i32_1 = arith.constant 0 : i32
    return %c0_i32, %c0_i32_0 : i32, i32
  }
  func.func @transform_2(%arg0: i32) -> (i32, i32) {
    %c0_i32 = arith.constant 0 : i32
    %c0_i32_0 = arith.constant 0 : i32
    %c0_i32_1 = arith.constant 0 : i32
    return %c0_i32, %c0_i32_0 : i32, i32
  }
  func.func @transform_3(%arg0: i32) -> (i32, i32) {
    %c0_i32 = arith.constant 0 : i32
    %c0_i32_0 = arith.constant 0 : i32
    return %arg0, %c0_i32 : i32, i32
  }
}

</mosaic_0001>

<bundles_post_ra>
// kernel: tpu_custom_call.1
= control target key start
LH: loop header
LB: loop body
LE: loop exit
PB: predicated region body
PF: predicated region fallthrough
CT: control target
= control target key end

     0   :  { %s161_s0 = inlined_call_operand.vmem [shape: f32[8,32], index: 0, kind: input, shape index: {}]   ;;  %s162_s1 = inlined_call_operand.vmem [shape: f32[32,8], index: 1, kind: input, shape index: {}]   ;;  %s163_s2 = inlined_call_operand.vmem [shape: f32[8,32], index: 2, kind: input, shape index: {}]   ;;  %s164_s3 = inlined_call_operand.hbm [shape: f32[8,32], index: 3, kind: output, shape index: {}]  }
   0x1   :  { %v19_v0 = vld [vmem:[%s162_s1 + $0x18] sm:$0xff]  ;;  %v18_v1 = vld [vmem:[%s162_s1 + $0x10] sm:$0xff] }
   0x2   :  { %36 = vmatpush.msra.mxu0 %v19_v0 }
   0x3   :  { %8 = vsyncpa [#allocation3], 0  ;;  %v17_v2 = vld [vmem:[%s162_s1 + $0x8] sm:$0xff]  ;;  %v16_v3 = vld [vmem:[%s162_s1] sm:$0xff]  ;;  %vm20_vm0 = vcmask 261120   ;;  %vm46_vm1 = vcmask 64512  }
   0x4   :  { %37 = vmatpush.msra.mxu0 %v18_v1  ;;  %v15_v4 = vld [vmem:[%s161_s0] sm:$0xff]  ;;  %s117_s24 = smov [#allocation2]   ;;  %s79_s27 = sshll.u32 %s164_s3, 4  ;;  %s80_s27 = int_to_ptr.hbm [resolvable:$true] %s79_s27 }
   0x5   :  { %v45_v5 = vld [vmem:[%s163_s2] sm:$0xff]  ;;  %s77_s1 = sshll.u32 %s117_s24, 4  ;;  %s78_s1 = int_to_ptr.vmem [resolvable:$true] %s77_s1 }
   0x6   :  { %38 = vmatpush.msra.mxu0 %v17_v2  ;;  %65 = vmatpush.msra.mxu1 %v45_v5 }
   0x8   :  { %39 = vmatpush.msra.mxu0 %v16_v3 }
   0x9   :  { %88 = vmatmul.msk.f32.vlgmr.msra.gmra.mxu0 %vm20_vm0, %v15_v4 }
  0x86   :  { %v41_v6 = vpop.f32.mrf.mxu0 }
  0x87   :  { %v44_v7 = vmax.f32 %v41_v6, 0.0 }
  0x89   :  { %89 = vmatmul.msk.f32.vlgmr.msra.gmra.mxu1 %vm46_vm1, %v44_v7 }
 0x106   :  { %v67_v8 = vpop.f32.mrf.mxu1 }
 0x107   :  { %v70_v9 = vmax.f32 %v67_v8, 0.0 }
 0x109   :  { %71 = vst.msk [vmem:[#allocation2] sm:$0xff] %vm20_vm0, %v70_v9 }
 0x10a   :  { %82 = dma.vmem_to_hbm [thread:$0]  %s78_s1, 128, %s80_s27, [#allocation3]  }
 0x10b   :  { %115 = dma.done.wait [#allocation3], 128  }
 0x10c   :  { %116 = vsyncadd [#allocation3], 4294967168 }
 0x10d   :  { %87 = vsyncpa [#allocation3], 1 }

// kernel: tpu_custom_call.1
= control target key start
LH: loop header
LB: loop body
LE: loop exit
PB: predicated region body
PF: predicated region fallthrough
CT: control target
= control target key end

     0   :  { %s161_s0 = inlined_call_operand.vmem [shape: f32[8,32], index: 0, kind: input, shape index: {}]   ;;  %s162_s1 = inlined_call_operand.vmem [shape: f32[32,8], index: 1, kind: input, shape index: {}]   ;;  %s163_s2 = inlined_call_operand.vmem [shape: f32[8,32], index: 2, kind: input, shape index: {}]   ;;  %s164_s3 = inlined_call_operand.hbm [shape: f32[8,32], index: 3, kind: output, shape index: {}]  }
   0x1   :  { %v19_v0 = vld [vmem:[%s162_s1 + $0x18] sm:$0xff]  ;;  %v18_v1 = vld [vmem:[%s162_s1 + $0x10] sm:$0xff] }
   0x2   :  { %36 = vmatpush.msra.mxu0 %v19_v0 }
   0x3   :  { %8 = vsyncpa [#allocation3], 0  ;;  %v17_v2 = vld [vmem:[%s162_s1 + $0x8] sm:$0xff]  ;;  %v16_v3 = vld [vmem:[%s162_s1] sm:$0xff]  ;;  %vm20_vm0 = vcmask 261120   ;;  %vm46_vm1 = vcmask 64512  }
   0x4   :  { %37 = vmatpush.msra.mxu0 %v18_v1  ;;  %v15_v4 = vld [vmem:[%s161_s0] sm:$0xff]  ;;  %s117_s24 = smov [#allocation2]   ;;  %s79_s27 = sshll.u32 %s164_s3, 4  ;;  %s80_s27 = int_to_ptr.hbm [resolvable:$true] %s79_s27 }
   0x5   :  { %v45_v5 = vld [vmem:[%s163_s2] sm:$0xff]  ;;  %s77_s1 = sshll.u32 %s117_s24, 4  ;;  %s78_s1 = int_to_ptr.vmem [resolvable:$true] %s77_s1 }
   0x6   :  { %38 = vmatpush.msra.mxu0 %v17_v2  ;;  %65 = vmatpush.msra.mxu1 %v45_v5 }
   0x8   :  { %39 = vmatpush.msra.mxu0 %v16_v3 }
   0x9   :  { %88 = vmatmul.msk.f32.vlgmr.msra.gmra.mxu0 %vm20_vm0, %v15_v4 }
  0x86   :  { %v41_v6 = vpop.f32.mrf.mxu0 }
  0x87   :  { %v44_v7 = vmax.f32 %v41_v6, 0.0 }
  0x89   :  { %89 = vmatmul.msk.f32.vlgmr.msra.gmra.mxu1 %vm46_vm1, %v44_v7 }
 0x106   :  { %v67_v8 = vpop.f32.mrf.mxu1 }
 0x107   :  { %v70_v9 = vmax.f32 %v67_v8, 0.0 }
 0x109   :  { %71 = vst.msk [vmem:[#allocation2] sm:$0xff] %vm20_vm0, %v70_v9 }
 0x10a   :  { %82 = dma.vmem_to_hbm [thread:$0]  %s78_s1, 128, %s80_s27, [#allocation3]  }
 0x10b   :  { %115 = dma.done.wait [#allocation3], 128  }
 0x10c   :  { %116 = vsyncadd [#allocation3], 4294967168 }
 0x10d   :  { %87 = vsyncpa [#allocation3], 1 }

</bundles_post_ra>
